<compile_context>
chip_gen: v5e
topology: v5e:2x2
jax: 0.10.0
libtpu: 0.0.40
codegen_flags: <defaults>
</compile_context>

<pallas_src>
import functools

import jax
import jax.numpy as jnp
from jax.experimental import pallas as pl
from jax.experimental.pallas import tpu as pltpu

LANE = 128
TILE_PREF = 2048                      # A-tile edge (bf16: 8 MiB, 16 MiB dbl-buffered)
VMEM_LIMIT = 48 * 1024 * 1024         # fits v5e/v6e (128 MiB) and v7x (64 MiB) VMEM
RESIDENT_H_BYTES = 16 * 1024 * 1024   # keep XW1 resident if its 2 buffers fit here


def _round_up(x, m):
    return (x + m - 1) // m * m


def _choose_tiles(n_true, preferred=TILE_PREF):
    """Pick (tile, n_pad): tile is a multiple of 128, n_pad a multiple of tile.

    * no divisibility cliff: n_pad is padded UP to the chosen tile; the tile is
      the largest one whose padding inflates the A_hat area by <= 10%;
    * tile capped at ceil(n/2) so there are >= 2 row tiles whenever the graph
      allows it, letting the v7x megacore shard the row axis.
    """
    n_min = _round_up(max(n_true, LANE), LANE)
    cap = min(preferred, max(LANE, _round_up((n_min + 1) // 2, LANE)))
    best_t = LANE
    for t in range(LANE, cap + 1, LANE):
        n_pad = _round_up(n_min, t)
        if n_pad * n_pad <= 1.10 * n_min * n_min:
            best_t = t
    return best_t, _round_up(n_min, best_t)


def _pad2d(a, rows, cols):
    return jnp.pad(a, ((0, rows - a.shape[0]), (0, cols - a.shape[1])))


# ----------------------------- Pallas kernels ------------------------------ #

def _xw_kernel(x_ref, w_ref, o_ref):
    """Row-tiled feature transform: o = X_tile @ W1 (bf16 MXU, f32 accumulate)."""
    o_ref[...] = jnp.dot(
        x_ref[...], w_ref[...], preferred_element_type=jnp.float32
    ).astype(o_ref.dtype)


def _agg_pool_kernel(a_ref, h_ref, b_ref, s_ref, part_ref, acc_ref, *,
                     tk, h_resident):
    """Fused layer-1 aggregation + pooled-feature partials.

    Row tile i:   H1_i      = relu(A_hat[i-tile, :] @ XW1 + b1)      (f32)
                  part[i]   = s[i-slice] @ H1_i                       (1, c_hid)
    Summing part over i (in JAX) yields s @ relu(A_hat @ XW1 + b1); layer 2 is
    then a tiny (1, c_hid) @ (c_hid, c_out) done outside the kernel.
    """
    k = pl.program_id(1)

    @pl.when(k == 0)
    def _():
        acc_ref[...] = jnp.zeros_like(acc_ref)

    if h_resident:
        start = pl.multiple_of(k * tk, tk)
        h_blk = h_ref[pl.ds(start, tk), :]        # slice the VMEM-resident XW1
    else:
        h_blk = h_ref[...]                        # per-k streamed tile
    acc_ref[...] += jnp.dot(a_ref[...], h_blk, preferred_element_type=jnp.float32)

    @pl.when(k == pl.num_programs(1) - 1)
    def _():
        h1 = jnp.maximum(acc_ref[...] + b_ref[...], 0.0)          # (tm, c_hid) f32
        pooled = jnp.dot(s_ref[...], h1, preferred_element_type=jnp.float32)
        part_ref[...] = pooled[None]                              # (1, 1, c_hid)


# ----------------------------- kernel wrappers ------------------------------ #

def xw_matmul(x, w, *, tm, out_dtype=jnp.bfloat16):
    n_pad, c_in = x.shape
    c_out = w.shape[1]
    return pl.pallas_call(
        _xw_kernel,
        out_shape=jax.ShapeDtypeStruct((n_pad, c_out), out_dtype),
        grid_spec=pltpu.PrefetchScalarGridSpec(
            num_scalar_prefetch=0,
            grid=(n_pad // tm,),
            in_specs=[
                pl.BlockSpec((tm, c_in), lambda i: (i, 0)),
                pl.BlockSpec((c_in, c_out), lambda i: (0, 0)),
            ],
            out_specs=pl.BlockSpec((tm, c_out), lambda i: (i, 0)),
        ),
        compiler_params=pltpu.CompilerParams(
            dimension_semantics=("parallel",),
            vmem_limit_bytes=VMEM_LIMIT,
        ),
    )(x, w)


def gcn_agg_pool(a_hat, xw1, b1, s, *, tm, tk):
    """partials[i] = s_slice_i @ relu(A_hat[i-tile, :] @ XW1 + b1)."""
    n_pad = a_hat.shape[0]
    c_hid = xw1.shape[1]
    n_row_tiles = n_pad // tm

    # XW1 fully VMEM-resident (constant index_map -> DMA'd once) unless the
    # graph is huge; fallback re-streams the (tk, c_hid) tile per k step.
    h_resident = 2 * xw1.size * xw1.dtype.itemsize <= RESIDENT_H_BYTES
    if h_resident:
        h_spec = pl.BlockSpec((n_pad, c_hid), lambda i, k: (0, 0))
    else:
        h_spec = pl.BlockSpec((tk, c_hid), lambda i, k: (k, 0))

    return pl.pallas_call(
        functools.partial(_agg_pool_kernel, tk=tk, h_resident=h_resident),
        out_shape=jax.ShapeDtypeStruct((n_row_tiles, 1, c_hid), jnp.float32),
        grid_spec=pltpu.PrefetchScalarGridSpec(
            num_scalar_prefetch=0,
            grid=(n_row_tiles, n_pad // tk),
            in_specs=[
                pl.BlockSpec((tm, tk), lambda i, k: (i, k)),      # A_hat tile (bf16)
                h_spec,                                           # XW1 (bf16)
                pl.BlockSpec((1, c_hid), lambda i, k: (0, 0)),    # b1 (f32)
                pl.BlockSpec((1, tm), lambda i, k: (0, i)),       # s slice (f32)
            ],
            out_specs=pl.BlockSpec((1, 1, c_hid), lambda i, k: (i, 0, 0)),
            scratch_shapes=[pltpu.VMEM((tm, c_hid), jnp.float32)],
        ),
        compiler_params=pltpu.CompilerParams(
            # per-row-tile partial outputs -> row axis is megacore-shardable
            dimension_semantics=("parallel", "arbitrary"),
            vmem_limit_bytes=VMEM_LIMIT,
        ),
    )(a_hat, xw1, b1, s)


# ------------------------------- JAX glue ---------------------------------- #

def build_graph_operators(edge_index, num_nodes, n_pad, a_dtype=jnp.bfloat16):
    """Dense A_hat = D^{-1/2}(A+I)D^{-1/2} (PyG gcn_norm) padded to n_pad, plus
    the pooling vector s = (1/n) * 1^T A_hat, computed in O(E) from the edges.

    edge_index: int32 [2, E]; row 0 = src, row 1 = dst.  Padded rows/cols are 0.
    NOTE: degree uses dst only — matches PyG gcn_norm for undirected edge lists
    (both directions present); silently differs for directed inputs.
    """
    src, dst = edge_index[0], edge_index[1]
    loops = jnp.arange(num_nodes, dtype=edge_index.dtype)
    src = jnp.concatenate([src, loops])
    dst = jnp.concatenate([dst, loops])
    ones = jnp.ones_like(src, dtype=jnp.float32)
    deg = jnp.zeros((num_nodes,), jnp.float32).at[dst].add(ones)
    deg_inv_sqrt = jnp.where(deg > 0, jax.lax.rsqrt(deg), 0.0)
    norm = deg_inv_sqrt[src] * deg_inv_sqrt[dst]
    a_hat = jnp.zeros((n_pad, n_pad), jnp.float32).at[dst, src].add(norm)
    colsum = jnp.zeros((n_pad,), jnp.float32).at[src].add(norm)      # 1^T A_hat
    s = (colsum / num_nodes)[None, :]                                # (1, n_pad) f32
    return a_hat.astype(a_dtype), s


def _prepare_padded(x, edge_index, params):
    n, c_in = x.shape
    c_hid = params["w1"].shape[1]
    tm, n_pad = _choose_tiles(n)
    # c_in kept lane-padded: X is only O(n*c_in) so the cost is negligible, and
    # it keeps every MXU operand (8,128)-aligned.
    c_in_p = _round_up(c_in, LANE)
    c_hid_p = _round_up(c_hid, LANE)

    a_hat, s = build_graph_operators(edge_index, n, n_pad, a_dtype=jnp.bfloat16)
    x_p = _pad2d(x, n_pad, c_in_p).astype(jnp.bfloat16)
    w1_p = _pad2d(params["w1"], c_in_p, c_hid_p).astype(jnp.bfloat16)
    b1_p = jnp.pad(params["b1"].astype(jnp.float32), (0, c_hid_p - c_hid))[None, :]
    return (n_pad, tm, c_hid), a_hat, s, x_p, w1_p, b1_p


def gcn_forward(x, edge_index, params):
    (n_pad, tm, c_hid), a_hat, s, x_p, w1_p, b1_p = _prepare_padded(
        x, edge_index, params
    )
    xw1 = xw_matmul(x_p, w1_p, tm=tm)                         # X @ W1   (bf16)
    partials = gcn_agg_pool(a_hat, xw1, b1_p, s, tm=tm, tk=tm)
    pooled_hidden = jnp.sum(partials[:, 0, :], axis=0, keepdims=True)  # (1, c_hid_p)
    # Layer-2 weight + bias on the single pooled vector: tiny, plain JAX.
    return pooled_hidden[:, :c_hid] @ params["w2"] + params["b2"]


def gcn_forward_ref_matched(x, edge_index, params):
    """Pure-JAX reference with the SAME quantization points / pool algebra."""
    (n_pad, tm, c_hid), a_hat, s, x_p, w1_p, b1_p = _prepare_padded(
        x, edge_index, params
    )
    xw1 = jnp.dot(x_p, w1_p, preferred_element_type=jnp.float32).astype(jnp.bfloat16)
    h1 = jnp.maximum(
        jnp.dot(a_hat, xw1, preferred_element_type=jnp.float32) + b1_p, 0.0
    )
    pooled_hidden = jnp.dot(s, h1)
    return pooled_hidden[:, :c_hid] @ params["w2"] + params["b2"]


def gcn_forward_ref_f32(x, edge_index, params):
    """Full-precision reference with the original (non-commuted) GCN math."""
    n = x.shape[0]
    a_hat, _ = build_graph_operators(edge_index, n, n, a_dtype=jnp.float32)
    h = jnp.maximum(a_hat @ (x @ params["w1"]) + params["b1"], 0.0)
    h = a_hat @ (h @ params["w2"]) + params["b2"]
    return jnp.mean(h, axis=0, keepdims=True)


def glorot(key, shape):
    fan_in, fan_out = shape
    limit = jnp.sqrt(6.0 / (fan_in + fan_out))
    return jax.random.uniform(key, shape, jnp.float32, -limit, limit)


# --------------------------------- main ------------------------------------ #

if __name__ == "__main__":
    num_nodes = 8
    in_channels = 4
    hidden_channels = 32
    out_channels = 8
    num_edges = 16

    key = jax.random.PRNGKey(0)
    kx, ke1, ke2, kw1, kw2 = jax.random.split(key, 5)

    x = jax.random.normal(kx, (num_nodes, in_channels), jnp.float32)
    src = jax.random.randint(ke1, (num_edges,), 0, num_nodes, jnp.int32)
    dst = jax.random.randint(ke2, (num_edges,), 0, num_nodes, jnp.int32)
    edge_index = jnp.stack([src, dst], axis=0)   # [2, E], PyG convention

    params = {
        "w1": glorot(kw1, (in_channels, hidden_channels)),
        "b1": jnp.zeros((hidden_channels,), jnp.float32),
        "w2": glorot(kw2, (hidden_channels, out_channels)),
        "b2": jnp.zeros((out_channels,), jnp.float32),
    }

    out = jax.jit(gcn_forward)(x, edge_index, params)
    out = jax.block_until_ready(out)
    assert out.shape == (1, out_channels)

    # Tight check against a precision-matched (bf16 X/W1/A_hat/XW1) reference.
    ref_m = gcn_forward_ref_matched(x, edge_index, params)
    assert jnp.allclose(out, ref_m, atol=2e-3, rtol=2e-3), (out, ref_m)

    # Loose check against full-f32 GCN math (bf16 quantization slack).
    ref_f = gcn_forward_ref_f32(x, edge_index, params)
    assert jnp.allclose(out, ref_f, atol=5e-2, rtol=5e-2), (out, ref_f)

    print("KERNEL_OK")
</pallas_src>

<mosaic_0001>
module attributes {stable_mosaic.version = 11 : i64} {
  func.func @_xw_kernel(%arg0: i32, %arg1: memref<128x128xbf16, #tpu.memory_space<vmem>>, %arg2: memref<128x128xbf16, #tpu.memory_space<vmem>>, %arg3: memref<128x128xbf16, #tpu.memory_space<vmem>>) attributes {dimension_semantics = [#tpu.dimension_semantics<parallel>], iteration_bounds = array<i64: 1>, scalar_prefetch = 0 : i64, scratch_operands = 0 : i64, tpu.core_type = #tpu.core_type<tc>, window_params = [{transform_indices = @transform_0, window_bounds = array<i64: 128, 128>}, {pipeline_mode = #tpu.pipeline_mode<synchronous>, transform_indices = @transform_1, window_bounds = array<i64: 128, 128>}, {transform_indices = @transform_2, window_bounds = array<i64: 128, 128>}]} {
    %c0 = arith.constant 0 : index
    %c0_0 = arith.constant 0 : index
    %0 = vector.load %arg1[%c0, %c0_0] : memref<128x128xbf16, #tpu.memory_space<vmem>>, vector<128x128xbf16>
    %c0_1 = arith.constant 0 : index
    %c0_2 = arith.constant 0 : index
    %1 = vector.load %arg2[%c0_1, %c0_2] : memref<128x128xbf16, #tpu.memory_space<vmem>>, vector<128x128xbf16>
    %cst = arith.constant dense<0.000000e+00> : vector<128x128xf32>
    %2 = tpu.matmul %0, %1, %cst {dimension_numbers = #tpu.dot_dimension_numbers<[1], [0], [0], [1], [0, 0, 1, 1], [], []>} : vector<128x128xbf16>, vector<128x128xbf16>, vector<128x128xf32> -> vector<128x128xf32>
    %3 = arith.truncf %2 : vector<128x128xf32> to vector<128x128xbf16>
    %c0_3 = arith.constant 0 : index
    %c0_4 = arith.constant 0 : index
    %4 = vector.load %arg3[%c0_3, %c0_4] : memref<128x128xbf16, #tpu.memory_space<vmem>>, vector<128x128xbf16>
    tpu.vector_store %arg3[%c0_3, %c0_4], %3 {strides = array<i32>} : memref<128x128xbf16, #tpu.memory_space<vmem>>, vector<128x128xbf16>,
    return
  }
  func.func @transform_0(%arg0: i32) -> (i32, i32) {
    %c0_i32 = arith.constant 0 : i32
    %c0_i32_0 = arith.constant 0 : i32
    return %arg0, %c0_i32 : i32, i32
  }
  func.func @transform_1(%arg0: i32) -> (i32, i32) {
    %c0_i32 = arith.constant 0 : i32
    %c0_i32_0 = arith.constant 0 : i32
    %c0_i32_1 = arith.constant 0 : i32
    return %c0_i32, %c0_i32_0 : i32, i32
  }
  func.func @transform_2(%arg0: i32) -> (i32, i32) {
    %c0_i32 = arith.constant 0 : i32
    %c0_i32_0 = arith.constant 0 : i32
    return %arg0, %c0_i32 : i32, i32
  }
}

module attributes {stable_mosaic.version = 11 : i64} {
  func.func @_agg_pool_kernel(%arg0: i32, %arg1: i32, %arg2: memref<128x128xbf16, #tpu.memory_space<vmem>>, %arg3: memref<128x128xbf16, #tpu.memory_space<vmem>>, %arg4: memref<1x128xf32, #tpu.memory_space<vmem>>, %arg5: memref<1x128xf32, #tpu.memory_space<vmem>>, %arg6: memref<1x1x128xf32, #tpu.memory_space<vmem>>, %arg7: memref<128x128xf32, #tpu.memory_space<vmem>>) attributes {dimension_semantics = [#tpu.dimension_semantics<parallel>, #tpu.dimension_semantics<arbitrary>], iteration_bounds = array<i64: 1, 1>, scalar_prefetch = 0 : i64, scratch_operands = 1 : i64, tpu.core_type = #tpu.core_type<tc>, window_params = [{transform_indices = @transform_0, window_bounds = array<i64: 128, 128>}, {pipeline_mode = #tpu.pipeline_mode<synchronous>, transform_indices = @transform_1, window_bounds = array<i64: 128, 128>}, {pipeline_mode = #tpu.pipeline_mode<synchronous>, transform_indices = @transform_2, window_bounds = array<i64: 1, 128>}, {transform_indices = @transform_3, window_bounds = array<i64: 1, 128>}, {transform_indices = @transform_4, window_bounds = array<i64: 1, 1, 128>}]} {
    %c0_i32 = arith.constant 0 : i32
    %0 = arith.cmpi eq, %arg1, %c0_i32 : i32
    %1 = arith.extui %0 : i1 to i32
    %c0_i32_0 = arith.constant 0 : i32
    %2 = arith.cmpi ne, %1, %c0_i32_0 : i32
    scf.if %2 {
      %cst_9 = arith.constant 0.000000e+00 : f32
      %15 = vector.broadcast %cst_9 : f32 to vector<128x128xf32>
      %c0_10 = arith.constant 0 : index
      %c0_11 = arith.constant 0 : index
      %16 = vector.load %arg7[%c0_10, %c0_11] : memref<128x128xf32, #tpu.memory_space<vmem>>, vector<128x128xf32>
      tpu.vector_store %arg7[%c0_10, %c0_11], %15 {strides = array<i32>} : memref<128x128xf32, #tpu.memory_space<vmem>>, vector<128x128xf32>,
    } else {
    }
    %c128_i32 = arith.constant 128 : i32
    %3 = arith.muli %arg1, %c128_i32 : i32
    %4 = tpu.assume_multiple %3, 128 : i32
    %5 = arith.index_cast %4 : i32 to index
    %c0 = arith.constant 0 : index
    %6 = vector.load %arg3[%5, %c0] : memref<128x128xbf16, #tpu.memory_space<vmem>>, vector<128x128xbf16>
    %c0_1 = arith.constant 0 : index
    %c0_2 = arith.constant 0 : index
    %7 = vector.load %arg7[%c0_1, %c0_2] : memref<128x128xf32, #tpu.memory_space<vmem>>, vector<128x128xf32>
    %c0_3 = arith.constant 0 : index
    %c0_4 = arith.constant 0 : index
    %8 = vector.load %arg2[%c0_3, %c0_4] : memref<128x128xbf16, #tpu.memory_space<vmem>>, vector<128x128xbf16>
    %cst = arith.constant dense<0.000000e+00> : vector<128x128xf32>
    %9 = tpu.matmul %8, %6, %cst {dimension_numbers = #tpu.dot_dimension_numbers<[1], [0], [0], [1], [0, 0, 1, 1], [], []>} : vector<128x128xbf16>, vector<128x128xbf16>, vector<128x128xf32> -> vector<128x128xf32>
    %10 = arith.addf %7, %9 : vector<128x128xf32>
    %c0_5 = arith.constant 0 : index
    %c0_6 = arith.constant 0 : index
    %11 = vector.load %arg7[%c0_5, %c0_6] : memref<128x128xf32, #tpu.memory_space<vmem>>, vector<128x128xf32>
    tpu.vector_store %arg7[%c0_5, %c0_6], %10 {strides = array<i32>} : memref<128x128xf32, #tpu.memory_space<vmem>>, vector<128x128xf32>,
    %c0_i32_7 = arith.constant 0 : i32
    %12 = arith.cmpi eq, %arg1, %c0_i32_7 : i32
    %13 = arith.extui %12 : i1 to i32
    %c0_i32_8 = arith.constant 0 : i32
    %14 = arith.cmpi ne, %13, %c0_i32_8 : i32
    scf.if %14 {
      %c0_9 = arith.constant 0 : index
      %c0_10 = arith.constant 0 : index
      %15 = vector.load %arg7[%c0_9, %c0_10] : memref<128x128xf32, #tpu.memory_space<vmem>>, vector<128x128xf32>
      %c0_11 = arith.constant 0 : index
      %c0_12 = arith.constant 0 : index
      %16 = vector.load %arg4[%c0_11, %c0_12] : memref<1x128xf32, #tpu.memory_space<vmem>>, vector<1x128xf32>
      %17 = vector.broadcast %16 : vector<1x128xf32> to vector<128x128xf32>
      %18 = arith.addf %15, %17 : vector<128x128xf32>
      %cst_13 = arith.constant 0.000000e+00 : f32
      %19 = vector.broadcast %cst_13 : f32 to vector<128x128xf32>
      %20 = arith.maximumf %18, %19 : vector<128x128xf32>
      %c0_14 = arith.constant 0 : index
      %c0_15 = arith.constant 0 : index
      %21 = vector.load %arg5[%c0_14, %c0_15] : memref<1x128xf32, #tpu.memory_space<vmem>>, vector<1x128xf32>
      %cst_16 = arith.constant dense<0.000000e+00> : vector<1x128xf32>
      %22 = tpu.matmul %21, %20, %cst_16 {dimension_numbers = #tpu.dot_dimension_numbers<[1], [0], [0], [1], [0, 0, 1, 1], [], []>} : vector<1x128xf32>, vector<128x128xf32>, vector<1x128xf32> -> vector<1x128xf32>
      %23 = vector.shape_cast %22 : vector<1x128xf32> to vector<1x1x128xf32>
      %c0_17 = arith.constant 0 : index
      %c0_18 = arith.constant 0 : index
      %c0_19 = arith.constant 0 : index
      %24 = vector.load %arg6[%c0_17, %c0_18, %c0_19] : memref<1x1x128xf32, #tpu.memory_space<vmem>>, vector<1x1x128xf32>
      tpu.vector_store %arg6[%c0_17, %c0_18, %c0_19], %23 {strides = array<i32>} : memref<1x1x128xf32, #tpu.memory_space<vmem>>, vector<1x1x128xf32>,
    } else {
    }
    return
  }
  func.func @transform_0(%arg0: i32, %arg1: i32) -> (i32, i32) {
    %c0_i32 = arith.constant 0 : i32
    return %arg0, %arg1 : i32, i32
  }
  func.func @transform_1(%arg0: i32, %arg1: i32) -> (i32, i32) {
    %c0_i32 = arith.constant 0 : i32
    %c0_i32_0 = arith.constant 0 : i32
    %c0_i32_1 = arith.constant 0 : i32
    return %c0_i32, %c0_i32_0 : i32, i32
  }
  func.func @transform_2(%arg0: i32, %arg1: i32) -> (i32, i32) {
    %c0_i32 = arith.constant 0 : i32
    %c0_i32_0 = arith.constant 0 : i32
    %c0_i32_1 = arith.constant 0 : i32
    return %c0_i32, %c0_i32_0 : i32, i32
  }
  func.func @transform_3(%arg0: i32, %arg1: i32) -> (i32, i32) {
    %c0_i32 = arith.constant 0 : i32
    %c0_i32_0 = arith.constant 0 : i32
    return %c0_i32, %arg0 : i32, i32
  }
  func.func @transform_4(%arg0: i32, %arg1: i32) -> (i32, i32, i32) {
    %c0_i32 = arith.constant 0 : i32
    %c0_i32_0 = arith.constant 0 : i32
    %c0_i32_1 = arith.constant 0 : i32
    return %arg0, %c0_i32, %c0_i32_0 : i32, i32, i32
  }
}

</mosaic_0001>

<bundles_post_ra>
// kernel: mul.1
= control target key start
LH: loop header
LB: loop body
LE: loop exit
PB: predicated region body
PF: predicated region fallthrough
CT: control target
= control target key end

     0   :  { %s34_s0 = inlined_call_operand.vmem [shape: f32[24], index: 0, kind: input, shape index: {}]   ;;  %s35_s1 = inlined_call_operand.vmem [shape: f32[24], index: 1, kind: input, shape index: {}]   ;;  %s36_s2 = inlined_call_operand.vmem [shape: f32[24], index: 2, kind: output, shape index: {}]  }
   0x1   :  { %v3_v0 = vld [vmem:[%s34_s0] sm:$0x1] }
   0x2   :  { %v4_v1 = vld [vmem:[%s35_s1] sm:$0x1] }
   0x3   :  { %v7_v2 = vmul.f32 %v4_v1, %v3_v0 }
   0x5   :  { %9 = vst [vmem:[%s36_s2] sm:$0x1] %v7_v2 }

// kernel: gcn_forward.2
= control target key start
LH: loop header
LB: loop body
LE: loop exit
PB: predicated region body
PF: predicated region fallthrough
CT: control target
= control target key end

     0   :  { %s462_s1 = inlined_call_operand.vmem [shape: bf16[128,128], index: 1, kind: input, shape index: {}]   ;;  %s463_s0 = inlined_call_operand.vmem [shape: bf16[128,128], index: 0, kind: input, shape index: {}]   ;;  %s464_s2 = inlined_call_operand.vmem [shape: bf16[128,128], index: 2, kind: output, shape index: {}]  }
   0x1   :  { %v303_v0 = vld [vmem:[%s462_s1 + $0x38] sm:$0xff]  ;;  %v302_v1 = vld [vmem:[%s462_s1 + $0x30] sm:$0xff]  ;;  %v301_v2 = vld [vmem:[%s462_s1 + $0x28] sm:$0xff] }
   0x2   :  { %139 = vmatpush.bf16.msra.mxu0 %v303_v0  ;;  %351 = vmatpush.bf16.msra.mxu1 %v303_v0  ;;  %v300_v3 = vld [vmem:[%s462_s1 + $0x20] sm:$0xff]  ;;  %v299_v4 = vld [vmem:[%s462_s1 + $0x18] sm:$0xff]  ;;  %v298_v5 = vld [vmem:[%s462_s1 + $0x10] sm:$0xff] }
   0x3   :  { %352 = vmatpush.bf16.msra.mxu2 %v303_v0  ;;  %353 = vmatpush.bf16.msra.mxu3 %v303_v0  ;;  %v297_v6 = vld [vmem:[%s462_s1 + $0x8] sm:$0xff]  ;;  %v296_v7 = vld [vmem:[%s462_s1] sm:$0xff]  ;;  %v290_v9 = vld [vmem:[%s463_s0 + $0x10] sm:$0xff] }
   0x4   :  { %v288_v8 = vld [vmem:[%s463_s0] sm:$0xff]  ;;  %v294_v11 = vld [vmem:[%s463_s0 + $0x30] sm:$0xff]  ;;  %v289_v12 = vld [vmem:[%s463_s0 + $0x8] sm:$0xff] }
   0x5   :  { %v292_v10 = vld [vmem:[%s463_s0 + $0x20] sm:$0xff]  ;;  %v291_v13 = vld [vmem:[%s463_s0 + $0x18] sm:$0xff]  ;;  %v293_v14 = vld [vmem:[%s463_s0 + $0x28] sm:$0xff] }
   0x6   :  { %140 = vmatpush.bf16.msra.mxu0 %v302_v1  ;;  %354 = vmatpush.bf16.msra.mxu1 %v302_v1  ;;  %v295_v15 = vld [vmem:[%s463_s0 + $0x38] sm:$0xff] }
   0x7   :  { %355 = vmatpush.bf16.msra.mxu2 %v302_v1  ;;  %356 = vmatpush.bf16.msra.mxu3 %v302_v1 }
   0xa   :  { %141 = vmatpush.bf16.msra.mxu0 %v301_v2  ;;  %357 = vmatpush.bf16.msra.mxu1 %v301_v2 }
   0xb   :  { %358 = vmatpush.bf16.msra.mxu2 %v301_v2  ;;  %359 = vmatpush.bf16.msra.mxu3 %v301_v2 }
   0xe   :  { %142 = vmatpush.bf16.msra.mxu0 %v300_v3  ;;  %360 = vmatpush.bf16.msra.mxu1 %v300_v3 }
   0xf   :  { %361 = vmatpush.bf16.msra.mxu2 %v300_v3  ;;  %362 = vmatpush.bf16.msra.mxu3 %v300_v3 }
  0x12   :  { %143 = vmatpush.bf16.msra.mxu0 %v299_v4  ;;  %363 = vmatpush.bf16.msra.mxu1 %v299_v4 }
  0x13   :  { %364 = vmatpush.bf16.msra.mxu2 %v299_v4  ;;  %365 = vmatpush.bf16.msra.mxu3 %v299_v4 }
  0x16   :  { %144 = vmatpush.bf16.msra.mxu0 %v298_v5  ;;  %366 = vmatpush.bf16.msra.mxu1 %v298_v5 }
  0x17   :  { %367 = vmatpush.bf16.msra.mxu2 %v298_v5  ;;  %368 = vmatpush.bf16.msra.mxu3 %v298_v5 }
  0x1a   :  { %145 = vmatpush.bf16.msra.mxu0 %v297_v6  ;;  %369 = vmatpush.bf16.msra.mxu1 %v297_v6 }
  0x1b   :  { %370 = vmatpush.bf16.msra.mxu2 %v297_v6  ;;  %371 = vmatpush.bf16.msra.mxu3 %v297_v6 }
  0x1e   :  { %146 = vmatpush.bf16.msra.mxu0 %v296_v7  ;;  %372 = vmatpush.bf16.msra.mxu1 %v296_v7 }
  0x1f   :  { %373 = vmatpush.bf16.msra.mxu2 %v296_v7  ;;  %374 = vmatpush.bf16.msra.mxu3 %v296_v7 }
  0x21   :  { %147 = vmatmul.bf16.vlgmr.msra.gmra.mxu0 %v288_v8  ;;  %157 = vmatmul.bf16.vlgmr.msra.gmra.mxu1 %v290_v9 }
  0x22   :  { %167 = vmatmul.bf16.vlgmr.msra.gmra.mxu2 %v292_v10  ;;  %177 = vmatmul.bf16.vlgmr.msra.gmra.mxu3 %v294_v11 }
  0x31   :  { %152 = vmatmul.bf16.gmra.mxu0 %v289_v12  ;;  %162 = vmatmul.bf16.gmra.mxu1 %v291_v13 }
  0x32   :  { %172 = vmatmul.bf16.gmra.mxu2 %v293_v14  ;;  %182 = vmatmul.bf16.gmra.mxu3 %v295_v15 }
  0x9e   :  { %v148_v16 = vpop.f32.mrf.mxu0  ;;  %v158_v17 = vpop.f32.mrf.mxu1 }
  0xa5   :  { %v168_v18 = vpop.f32.mrf.mxu2  ;;  %v178_v19 = vpop.f32.mrf.mxu3 }
  0xa6   :  { %v150_v20 = vpop.f32.mrf.mxu0  ;;  %v160_v21 = vpop.f32.mrf.mxu1 }
  0xa7   :  { %v307_v22 = vpack.c.bf16 %v150_v20, %v148_v16  ;;  %v317_v23 = vpack.c.bf16 %v160_v21, %v158_v17 }
  0xa9   :  { %308 = vst [vmem:[%s464_s2] sm:$0xff] %v307_v22  }
  0xaa   :  { %345 = vst [vmem:[%s464_s2 + $0x10] sm:$0xff] %v317_v23  }
  0xad   :  { %v170_v24 = vpop.f32.mrf.mxu2  ;;  %v180_v25 = vpop.f32.mrf.mxu3 }
  0xae   :  { %v327_v26 = vpack.c.bf16 %v170_v24, %v168_v18  ;;  %v337_v27 = vpack.c.bf16 %v180_v25, %v178_v19  ;;  %v153_v28 = vpop.f32.mrf.mxu0  ;;  %v163_v29 = vpop.f32.mrf.mxu1 }
  0xb0   :  { %347 = vst [vmem:[%s464_s2 + $0x20] sm:$0xff] %v327_v26  }
  0xb1   :  { %349 = vst [vmem:[%s464_s2 + $0x30] sm:$0xff] %v337_v27  }
  0xb5   :  { %v173_v30 = vpop.f32.mrf.mxu2  ;;  %v183_v31 = vpop.f32.mrf.mxu3 }
  0xb6   :  { %v155_v32 = vpop.f32.mrf.mxu0  ;;  %v165_v33 = vpop.f32.mrf.mxu1 }
  0xb7   :  { %v312_v34 = vpack.c.bf16 %v155_v32, %v153_v28  ;;  %v322_v35 = vpack.c.bf16 %v165_v33, %v163_v29 }
  0xb9   :  { %344 = vst [vmem:[%s464_s2 + $0x8] sm:$0xff] %v312_v34  }
  0xba   :  { %346 = vst [vmem:[%s464_s2 + $0x18] sm:$0xff] %v322_v35  }
  0xbd   :  { %v175_v36 = vpop.f32.mrf.mxu2  ;;  %v185_v37 = vpop.f32.mrf.mxu3 }
  0xbe   :  { %v332_v38 = vpack.c.bf16 %v175_v36, %v173_v30  ;;  %v342_v39 = vpack.c.bf16 %v185_v37, %v183_v31 }
  0xc0   :  { %348 = vst [vmem:[%s464_s2 + $0x28] sm:$0xff] %v332_v38  }
  0xc1   :  { %350 = vst [vmem:[%s464_s2 + $0x38] sm:$0xff] %v342_v39  }

// kernel: gcn_forward.3
= control target key start
LH: loop header
LB: loop body
LE: loop exit
PB: predicated region body
PF: predicated region fallthrough
CT: control target
= control target key end

     0   :  { %s537_s1 = inlined_call_operand.vmem [shape: bf16[128,128], index: 1, kind: input, shape index: {}]   ;;  %s538_s2 = inlined_call_operand.vmem [shape: f32[1,128], index: 2, kind: input, shape index: {}]   ;;  %s539_s0 = inlined_call_operand.vmem [shape: bf16[128,128], index: 0, kind: input, shape index: {}]   ;;  %s540_s3 = inlined_call_operand.vmem [shape: f32[1,128], index: 3, kind: input, shape index: {}]   ;;  %s541_s4 = inlined_call_operand.vmem [shape: f32[1,1,128], index: 4, kind: output, shape index: {}]  }
   0x1   :  { %v421_v0 = vld [vmem:[%s537_s1 + $0x38] sm:$0xff]  ;;  %v420_v1 = vld [vmem:[%s537_s1 + $0x30] sm:$0xff]  ;;  %v419_v2 = vld [vmem:[%s537_s1 + $0x28] sm:$0xff] }
   0x2   :  { %432 = vmatpush.bf16.msra.mxu3 %v421_v0  ;;  %430 = vmatpush.bf16.msra.mxu1 %v421_v0  ;;  %v418_v3 = vld [vmem:[%s537_s1 + $0x20] sm:$0xff]  ;;  %v417_v4 = vld [vmem:[%s537_s1 + $0x18] sm:$0xff]  ;;  %v416_v5 = vld [vmem:[%s537_s1 + $0x10] sm:$0xff] }
   0x3   :  { %431 = vmatpush.bf16.msra.mxu2 %v421_v0  ;;  %186 = vmatpush.bf16.msra.mxu0 %v421_v0  ;;  %v415_v6 = vld [vmem:[%s537_s1 + $0x8] sm:$0xff]  ;;  %v414_v7 = vld [vmem:[%s537_s1] sm:$0xff]  ;;  %v424_v9 = vld [vmem:[%s539_s0 + $0x10] sm:$0xff] }
   0x4   :  { %v427_v8 = vld [vmem:[%s539_s0 + $0x28] sm:$0xff]  ;;  %v426_v10 = vld [vmem:[%s539_s0 + $0x20] sm:$0xff]  ;;  %v428_v12 = vld [vmem:[%s539_s0 + $0x30] sm:$0xff] }
   0x5   :  { %v422_v11 = vld [vmem:[%s539_s0] sm:$0xff]  ;;  %v425_v13 = vld [vmem:[%s539_s0 + $0x18] sm:$0xff]  ;;  %v423_v14 = vld [vmem:[%s539_s0 + $0x8] sm:$0xff] }
   0x6   :  { %435 = vmatpush.bf16.msra.mxu3 %v420_v1  ;;  %433 = vmatpush.bf16.msra.mxu1 %v420_v1  ;;  %v429_v15 = vld [vmem:[%s539_s0 + $0x38] sm:$0xff]  ;;  %v454_v25 = vld [vmem:[%s538_s2] ss:$0 sm:$0xff] }
   0x7   :  { %434 = vmatpush.bf16.msra.mxu2 %v420_v1  ;;  %187 = vmatpush.bf16.msra.mxu0 %v420_v1  ;;  %v322_v1 = vld [vmem:[%s540_s3] sm:$0x1] }
   0xa   :  { %438 = vmatpush.bf16.msra.mxu3 %v419_v2  ;;  %436 = vmatpush.bf16.msra.mxu1 %v419_v2 }
   0xb   :  { %437 = vmatpush.bf16.msra.mxu2 %v419_v2  ;;  %188 = vmatpush.bf16.msra.mxu0 %v419_v2 }
   0xe   :  { %441 = vmatpush.bf16.msra.mxu3 %v418_v3  ;;  %439 = vmatpush.bf16.msra.mxu1 %v418_v3 }
   0xf   :  { %440 = vmatpush.bf16.msra.mxu2 %v418_v3  ;;  %189 = vmatpush.bf16.msra.mxu0 %v418_v3 }
  0x12   :  { %444 = vmatpush.bf16.msra.mxu3 %v417_v4  ;;  %442 = vmatpush.bf16.msra.mxu1 %v417_v4 }
  0x13   :  { %443 = vmatpush.bf16.msra.mxu2 %v417_v4  ;;  %190 = vmatpush.bf16.msra.mxu0 %v417_v4 }
  0x16   :  { %447 = vmatpush.bf16.msra.mxu3 %v416_v5  ;;  %445 = vmatpush.bf16.msra.mxu1 %v416_v5 }
  0x17   :  { %446 = vmatpush.bf16.msra.mxu2 %v416_v5  ;;  %191 = vmatpush.bf16.msra.mxu0 %v416_v5 }
  0x1a   :  { %450 = vmatpush.bf16.msra.mxu3 %v415_v6  ;;  %448 = vmatpush.bf16.msra.mxu1 %v415_v6 }
  0x1b   :  { %449 = vmatpush.bf16.msra.mxu2 %v415_v6  ;;  %192 = vmatpush.bf16.msra.mxu0 %v415_v6 }
  0x1e   :  { %453 = vmatpush.bf16.msra.mxu3 %v414_v7  ;;  %451 = vmatpush.bf16.msra.mxu1 %v414_v7 }
  0x1f   :  { %452 = vmatpush.bf16.msra.mxu2 %v414_v7  ;;  %193 = vmatpush.bf16.msra.mxu0 %v414_v7 }
  0x21   :  { %219 = vmatmul.bf16.vlgmr.msra.gmra.mxu3 %v427_v8  ;;  %204 = vmatmul.bf16.vlgmr.msra.gmra.mxu1 %v424_v9 }
  0x22   :  { %214 = vmatmul.bf16.vlgmr.msra.gmra.mxu2 %v426_v10  ;;  %194 = vmatmul.bf16.vlgmr.msra.gmra.mxu0 %v422_v11 }
  0x31   :  { %224 = vmatmul.bf16.gmra.mxu3 %v428_v12  ;;  %209 = vmatmul.bf16.gmra.mxu1 %v425_v13 }
  0x32   :  { %199 = vmatmul.bf16.gmra.mxu0 %v423_v14 }
  0x41   :  { %229 = vmatmul.bf16.gmra.mxu3 %v429_v15 }
  0x9e   :  { %v205_v19 = vpop.f32.mrf.mxu1 }
  0x9f   :  { %v195_v21 = vpop.f32.mrf.mxu0  ;;  %v294_v53 = vadd.f32 %v454_v25, %v205_v19 }
  0xa0   :  { %v290_v61 = vadd.f32 %v454_v25, %v195_v21 }
  0xa1   :  { %v310_v57 = vmax.f32 %v294_v53, 0.0 }
  0xa2   :  { %v306_v0 = vmax.f32 %v290_v61, 0.0 }
  0xa4   :  { %v220_v16 = vpop.f32.mrf.mxu3 }
  0xa5   :  { %v215_v24 = vpop.f32.mrf.mxu2  ;;  %v300_v38 = vadd.f32 %v454_v25, %v220_v16 }
  0xa6   :  { %v207_v22 = vpop.f32.mrf.mxu1  ;;  %v298_v45 = vadd.f32 %v454_v25, %v215_v24 }
  0xa7   :  { %v197_v26 = vpop.f32.mrf.mxu0  ;;  %v316_v44 = vmax.f32 %v300_v38, 0.0  ;;  %v295_v50 = vadd.f32 %v454_v25, %v207_v22 }
  0xa8   :  { %v314_v48 = vmax.f32 %v298_v45, 0.0  ;;  %v291_v59 = vadd.f32 %v454_v25, %v197_v26 }
  0xa9   :  { %v311_v55 = vmax.f32 %v295_v50, 0.0 }
  0xaa   :  { %v307_v63 = vmax.f32 %v291_v59, 0.0 }
  0xac   :  { %v222_v17 = vpop.f32.mrf.mxu3 }
  0xad   :  { %v301_v35 = vadd.f32 %v454_v25, %v222_v17  ;;  %v217_v37 = vpop.f32.mrf.mxu2 }
  0xae   :  { %v210_v30 = vpop.f32.mrf.mxu1  ;;  %v299_v42 = vadd.f32 %v454_v25, %v217_v37 }
  0xaf   :  { %v200_v40 = vpop.f32.mrf.mxu0  ;;  %v317_v41 = vmax.f32 %v301_v35, 0.0  ;;  %v296_v49 = vadd.f32 %v454_v25, %v210_v30 }
  0xb0   :  { %v315_v46 = vmax.f32 %v299_v42, 0.0  ;;  %v292_v58 = vadd.f32 %v454_v25, %v200_v40 }
  0xb1   :  { %v312_v54 = vmax.f32 %v296_v49, 0.0 }
  0xb2   :  { %v308_v62 = vmax.f32 %v292_v58, 0.0 }
  0xb4   :  { %v225_v18 = vpop.f32.mrf.mxu3 }
  0xb5   :  { %v302_v33 = vadd.f32 %v454_v25, %v225_v18 }
  0xb6   :  { %v212_v43 = vpop.f32.mrf.mxu1 }
  0xb7   :  { %v318_v39 = vmax.f32 %v302_v33, 0.0  ;;  %v297_v47 = vadd.f32 %v454_v25, %v212_v43  ;;  %v202_v52 = vpop.f32.mrf.mxu0 }
  0xb8   :  { %v293_v56 = vadd.f32 %v454_v25, %v202_v52 }
  0xb9   :  { %v313_v51 = vmax.f32 %v297_v47, 0.0 }
  0xba   :  { %v309_v60 = vmax.f32 %v293_v56, 0.0 }
  0xbc   :  { %v227_v20 = vpop.f32.mrf.mxu3 }
  0xbd   :  { %v303_v31 = vadd.f32 %v454_v25, %v227_v20 }
  0xbf   :  { %v319_v36 = vmax.f32 %v303_v31, 0.0 }
  0xc4   :  { %v230_v23 = vpop.f32.mrf.mxu3 }
  0xc5   :  { %v304_v28 = vadd.f32 %v454_v25, %v230_v23 }
  0xc7   :  { %v320_v34 = vmax.f32 %v304_v28, 0.0 }
  0xcc   :  { %v232_v27 = vpop.f32.mrf.mxu3 }
  0xcd   :  { %v305_v29 = vadd.f32 %v454_v25, %v232_v27 }
  0xcf   :  { %v321_v32 = vmax.f32 %v305_v29, 0.0 }
  0xd1   :  { %323 = vmatpush.msrb.mxu1 %v321_v32 }
  0xd3   :  { %324 = vmatpush.msrb.mxu1 %v320_v34 }
  0xd5   :  { %325 = vmatpush.msrb.mxu1 %v319_v36 }
  0xd7   :  { %326 = vmatpush.msrb.mxu1 %v318_v39 }
  0xd9   :  { %327 = vmatpush.msrb.mxu1 %v317_v41 }
  0xdb   :  { %328 = vmatpush.msrb.mxu1 %v316_v44 }
  0xdd   :  { %329 = vmatpush.msrb.mxu1 %v315_v46 }
  0xdf   :  { %330 = vmatpush.msrb.mxu1 %v314_v48 }
  0xe1   :  { %331 = vmatpush.msrb.mxu1 %v313_v51 }
  0xe3   :  { %332 = vmatpush.msrb.mxu1 %v312_v54 }
  0xe5   :  { %333 = vmatpush.msrb.mxu1 %v311_v55 }
  0xe7   :  { %334 = vmatpush.msrb.mxu1 %v310_v57 }
  0xe9   :  { %335 = vmatpush.msrb.mxu1 %v309_v60 }
  0xeb   :  { %336 = vmatpush.msrb.mxu1 %v308_v62 }
  0xed   :  { %337 = vmatpush.msrb.mxu1 %v307_v63 }
  0xef   :  { %338 = vmatpush.msrb.mxu1 %v306_v0 }
  0xf0   :  { %339 = vmatmul.f32.vlgmr.msrb.gmra.mxu1 %v322_v1 }
 0x16d   :  { %v340_v2 = vpop.f32.mrf.mxu1 }
 0x16e   :  { %343 = vst [vmem:[%s541_s4] sm:$0x1] %v340_v2 }

</bundles_post_ra>
